<compile_context>
chip_gen: v5e
topology: v5e:2x2
jax: 0.10.0
libtpu: 0.0.40
codegen_flags: <defaults>
</compile_context>

<pallas_src>
import functools

import jax
import jax.numpy as jnp
from jax.experimental import pallas as pl
from jax.experimental.pallas import tpu as pltpu


def neumf_kernel(n_mlp_layers, matmul_dtype, *refs):
    """Fused NeuMF forward for one batch tile (batch on the lane axis).

    refs = [gmf_u, gmf_i, mlp_u, mlp_i,                    # (E, tb) activations
            w1_user, w1_item, b1,                          # first MLP layer (BN folded, concat split)
            (w, b) * (n_mlp_layers - 1),                   # remaining MLP layers (BN folded)
            wn_gmf_col, wn_mlp_col, b_neu,                 # neu_layer as column vectors
            out_ref]                                       # (1, tb) lane-dense sigmoid scores
    """
    gmf_u_ref, gmf_i_ref, mlp_u_ref, mlp_i_ref = refs[:4]
    idx = 4
    w1u_ref, w1i_ref, b1_ref = refs[idx:idx + 3]
    idx += 3

    # --- MLP tower: Linear (BN folded) + ReLU.  First layer is a split matmul
    # over the user/item halves, so the concat never materializes. ---
    # TODO(synk): BatchNorm1d is in inference form (running stats folded); torch
    # train-mode batch statistics are not replicated here.
    h = jnp.dot(w1u_ref[...], mlp_u_ref[...].astype(matmul_dtype),
                preferred_element_type=jnp.float32)
    h = h + jnp.dot(w1i_ref[...], mlp_i_ref[...].astype(matmul_dtype),
                    preferred_element_type=jnp.float32)
    h = jnp.maximum(h + b1_ref[...], 0.0)
    for _ in range(n_mlp_layers - 1):
        w_ref, b_ref = refs[idx], refs[idx + 1]
        idx += 2
        h = jnp.dot(w_ref[...], h.astype(matmul_dtype),
                    preferred_element_type=jnp.float32)
        h = jnp.maximum(h + b_ref[...], 0.0)

    wn_gmf_ref, wn_mlp_ref, bneu_ref, out_ref = refs[idx:idx + 4]

    # --- GMF tower: elementwise product of the embedding rows (f32 on the VPU). ---
    gmf = gmf_u_ref[...].astype(jnp.float32) * gmf_i_ref[...].astype(jnp.float32)

    # --- neu_layer: instead of two width-1 MXU matmuls, do VPU multiply +
    # sublane reduction; the result is already a lane-dense (1, tb) row. ---
    logits = (jnp.sum(gmf * wn_gmf_ref[...], axis=0, keepdims=True)
              + jnp.sum(h * wn_mlp_ref[...], axis=0, keepdims=True)
              + bneu_ref[...])
    out_ref[...] = jax.nn.sigmoid(logits).astype(out_ref.dtype)


def init_params(key, user_no, item_no, gmf_emb, mlp_emb, layers):
    """Deterministic init mirroring NeuMF._init_weights (no checkpoint load)."""
    ks = jax.random.split(key, 4 + 2 * len(layers))
    ki = iter(ks)
    params = {}
    # Embeddings: normal(0, 0.01)
    params["gmf_user_emb"] = 0.01 * jax.random.normal(next(ki), (user_no, gmf_emb), jnp.float32)
    params["gmf_item_emb"] = 0.01 * jax.random.normal(next(ki), (item_no, gmf_emb), jnp.float32)
    params["mlp_user_emb"] = 0.01 * jax.random.normal(next(ki), (user_no, mlp_emb), jnp.float32)
    params["mlp_item_emb"] = 0.01 * jax.random.normal(next(ki), (item_no, mlp_emb), jnp.float32)

    # MLP tower: Linear (kaiming normal, zero bias, torch (out, in) layout)
    # + BatchNorm1d (gamma=1, beta=0, running_mean=0, running_var=1).
    mlp = []
    for in_size, out_size in zip(layers[:-1], layers[1:]):
        std = (2.0 / in_size) ** 0.5  # kaiming_normal_, fan_in, relu gain
        mlp.append(dict(
            w=std * jax.random.normal(next(ki), (out_size, in_size), jnp.float32),
            b=jnp.zeros((out_size,), jnp.float32),
            gamma=jnp.ones((out_size,), jnp.float32),
            beta=jnp.zeros((out_size,), jnp.float32),
            mean=jnp.zeros((out_size,), jnp.float32),
            var=jnp.ones((out_size,), jnp.float32),
        ))
    params["mlp"] = mlp

    # neu_layer: Linear(gmf_emb + layers[-1], 1), kaiming normal, zero bias.
    fan_in = gmf_emb + layers[-1]
    std = (2.0 / fan_in) ** 0.5
    params["neu_w"] = std * jax.random.normal(next(ki), (1, fan_in), jnp.float32)  # torch (out, in)
    params["neu_b"] = jnp.zeros((1,), jnp.float32)
    return params


def neumf_forward(users, items, params, *, tb=256, matmul_dtype=jnp.float32, eps=1e-5):
    """NeuMF forward.  tb: batch tile (multiple of 256 preferred on v6e/v7x,
    128 on v5e); matmul_dtype: dtype of MXU operands (bf16 recommended on v6e/v7x)."""
    B = users.shape[0]
    n_layers = len(params["mlp"])
    e_gmf = params["gmf_user_emb"].shape[1]
    e_mlp = params["mlp_user_emb"].shape[1]

    # Pad-and-slice path for ragged batches (rows are independent).
    B_pad = -(-B // tb) * tb
    if B_pad != B:
        users = jnp.pad(users, (0, B_pad - B))
        items = jnp.pad(items, (0, B_pad - B))

    # Embedding gathers (XLA glue), transposed so batch lands on the lane axis.
    gmf_u = params["gmf_user_emb"][users].T.astype(matmul_dtype)   # (E_gmf, B_pad)
    gmf_i = params["gmf_item_emb"][items].T.astype(matmul_dtype)   # (E_gmf, B_pad)
    mlp_u = params["mlp_user_emb"][users].T.astype(matmul_dtype)   # (E_mlp, B_pad)
    mlp_i = params["mlp_item_emb"][items].T.astype(matmul_dtype)   # (E_mlp, B_pad)

    # Fold BatchNorm into each Linear; split the first layer into user/item halves.
    operands = [gmf_u, gmf_i, mlp_u, mlp_i]
    for li, layer in enumerate(params["mlp"]):
        scale = layer["gamma"] / jnp.sqrt(layer["var"] + eps)                     # (out,)
        w = layer["w"] * scale[:, None]                                           # (out, in)
        b = (layer["b"] * scale + layer["beta"] - layer["mean"] * scale)[:, None]  # (out, 1)
        if li == 0:
            operands += [w[:, :e_mlp].astype(matmul_dtype),
                         w[:, e_mlp:].astype(matmul_dtype),
                         b.astype(jnp.float32)]
        else:
            operands += [w.astype(matmul_dtype), b.astype(jnp.float32)]

    wn = params["neu_w"]                                  # (1, e_gmf + layers[-1])
    operands += [wn[:, :e_gmf].T.astype(jnp.float32),     # (e_gmf, 1)
                 wn[:, e_gmf:].T.astype(jnp.float32),     # (layers[-1], 1)
                 params["neu_b"].reshape(1, 1).astype(jnp.float32)]

    in_specs = [pl.BlockSpec((e_gmf, tb), lambda i: (0, i)),
                pl.BlockSpec((e_gmf, tb), lambda i: (0, i)),
                pl.BlockSpec((e_mlp, tb), lambda i: (0, i)),
                pl.BlockSpec((e_mlp, tb), lambda i: (0, i))]
    # Weights / biases: full-array blocks, same block every step (fetched once).
    in_specs += [pl.BlockSpec(a.shape, lambda i: (0, 0)) for a in operands[4:]]

    out = pl.pallas_call(
        functools.partial(neumf_kernel, n_layers, matmul_dtype),
        out_shape=jax.ShapeDtypeStruct((1, B_pad), jnp.float32),
        grid_spec=pltpu.PrefetchScalarGridSpec(
            num_scalar_prefetch=0,
            grid=(B_pad // tb,),
            in_specs=in_specs,
            out_specs=pl.BlockSpec((1, tb), lambda i: (0, i)),  # lane-dense output tile
        ),
        compiler_params=pltpu.CompilerParams(
            dimension_semantics=("parallel",)),
    )(*operands)
    return out.reshape(-1)[:B]  # scores.view(-1)


def neumf_reference(users, items, params, eps=1e-5):
    """Pure-JAX reference of the same forward (BN in inference form)."""
    gmf = params["gmf_user_emb"][users] * params["gmf_item_emb"][items]
    h = jnp.concatenate(
        [params["mlp_user_emb"][users], params["mlp_item_emb"][items]], axis=-1)
    for layer in params["mlp"]:
        h = h @ layer["w"].T + layer["b"]
        h = (h - layer["mean"]) / jnp.sqrt(layer["var"] + eps) * layer["gamma"] + layer["beta"]
        h = jnp.maximum(h, 0.0)
    logits = jnp.concatenate([gmf, h], axis=-1) @ params["neu_w"].T + params["neu_b"]
    return jax.nn.sigmoid(logits.reshape(-1))


if __name__ == "__main__":
    # Small, NeuMF-consistent shapes.  BATCH is deliberately not a multiple of
    # the tile to exercise the pad-and-slice path (pads to 512 -> 2 grid steps).
    USER_NO, ITEM_NO = 64, 96
    GMF_EMB = 16
    MLP_EMB = 16
    LAYERS = [32, 64, 32, 16]          # layers[0] == 2 * MLP_EMB
    BATCH = 300
    TB = 256

    key = jax.random.PRNGKey(0)
    k_params, k_u, k_i = jax.random.split(key, 3)
    params = init_params(k_params, USER_NO, ITEM_NO, GMF_EMB, MLP_EMB, LAYERS)

    users = jax.random.randint(k_u, (BATCH,), 0, USER_NO, dtype=jnp.int32)
    items = jax.random.randint(k_i, (BATCH,), 0, ITEM_NO, dtype=jnp.int32)

    ref = neumf_reference(users, items, params)

    # f32 path (exact check on all generations).
    fwd_f32 = jax.jit(functools.partial(neumf_forward, tb=TB, matmul_dtype=jnp.float32))
    scores = jax.block_until_ready(fwd_f32(users, items, params))
    assert scores.shape == (BATCH,)
    assert jnp.allclose(scores, ref, atol=1e-5, rtol=1e-5), "f32 mismatch vs reference"

    # bf16 matmul-operand path (recommended on v6e/v7x): f32 accumulation, looser tol.
    fwd_bf16 = jax.jit(functools.partial(neumf_forward, tb=TB, matmul_dtype=jnp.bfloat16))
    scores_bf16 = jax.block_until_ready(fwd_bf16(users, items, params))
    assert scores_bf16.shape == (BATCH,)
    assert jnp.allclose(scores_bf16, ref, atol=3e-2, rtol=3e-2), "bf16 mismatch vs reference"

    print("KERNEL_OK")
</pallas_src>

<mosaic_0001>
module attributes {stable_mosaic.version = 11 : i64} {
  func.func @neumf_kernel(%arg0: i32, %arg1: memref<16x256xf32, #tpu.memory_space<vmem>>, %arg2: memref<16x256xf32, #tpu.memory_space<vmem>>, %arg3: memref<16x256xf32, #tpu.memory_space<vmem>>, %arg4: memref<16x256xf32, #tpu.memory_space<vmem>>, %arg5: memref<64x16xf32, #tpu.memory_space<vmem>>, %arg6: memref<64x16xf32, #tpu.memory_space<vmem>>, %arg7: memref<64x1xf32, #tpu.memory_space<vmem>>, %arg8: memref<32x64xf32, #tpu.memory_space<vmem>>, %arg9: memref<32x1xf32, #tpu.memory_space<vmem>>, %arg10: memref<16x32xf32, #tpu.memory_space<vmem>>, %arg11: memref<16x1xf32, #tpu.memory_space<vmem>>, %arg12: memref<16x1xf32, #tpu.memory_space<vmem>>, %arg13: memref<16x1xf32, #tpu.memory_space<vmem>>, %arg14: memref<1x1xf32, #tpu.memory_space<vmem>>, %arg15: memref<1x256xf32, #tpu.memory_space<vmem>>) attributes {dimension_semantics = [#tpu.dimension_semantics<parallel>], iteration_bounds = array<i64: 2>, scalar_prefetch = 0 : i64, scratch_operands = 0 : i64, tpu.core_type = #tpu.core_type<tc>, window_params = [{transform_indices = @transform_0, window_bounds = array<i64: 16, 256>}, {transform_indices = @transform_1, window_bounds = array<i64: 16, 256>}, {transform_indices = @transform_2, window_bounds = array<i64: 16, 256>}, {transform_indices = @transform_3, window_bounds = array<i64: 16, 256>}, {pipeline_mode = #tpu.pipeline_mode<synchronous>, transform_indices = @transform_4, window_bounds = array<i64: 64, 16>}, {pipeline_mode = #tpu.pipeline_mode<synchronous>, transform_indices = @transform_5, window_bounds = array<i64: 64, 16>}, {pipeline_mode = #tpu.pipeline_mode<synchronous>, transform_indices = @transform_6, window_bounds = array<i64: 64, 1>}, {pipeline_mode = #tpu.pipeline_mode<synchronous>, transform_indices = @transform_7, window_bounds = array<i64: 32, 64>}, {pipeline_mode = #tpu.pipeline_mode<synchronous>, transform_indices = @transform_8, window_bounds = array<i64: 32, 1>}, {pipeline_mode = #tpu.pipeline_mode<synchronous>, transform_indices = @transform_9, window_bounds = array<i64: 16, 32>}, {pipeline_mode = #tpu.pipeline_mode<synchronous>, transform_indices = @transform_10, window_bounds = array<i64: 16, 1>}, {pipeline_mode = #tpu.pipeline_mode<synchronous>, transform_indices = @transform_11, window_bounds = array<i64: 16, 1>}, {pipeline_mode = #tpu.pipeline_mode<synchronous>, transform_indices = @transform_12, window_bounds = array<i64: 16, 1>}, {pipeline_mode = #tpu.pipeline_mode<synchronous>, transform_indices = @transform_13, window_bounds = array<i64: 1, 1>}, {transform_indices = @transform_14, window_bounds = array<i64: 1, 256>}]} {
    %c0 = arith.constant 0 : index
    %c0_0 = arith.constant 0 : index
    %0 = vector.load %arg5[%c0, %c0_0] : memref<64x16xf32, #tpu.memory_space<vmem>>, vector<64x16xf32>
    %c0_1 = arith.constant 0 : index
    %c0_2 = arith.constant 0 : index
    %1 = vector.load %arg3[%c0_1, %c0_2] : memref<16x256xf32, #tpu.memory_space<vmem>>, vector<16x256xf32>
    %cst = arith.constant dense<0.000000e+00> : vector<64x256xf32>
    %2 = tpu.matmul %0, %1, %cst {dimension_numbers = #tpu.dot_dimension_numbers<[1], [0], [0], [1], [0, 0, 1, 1], [], []>} : vector<64x16xf32>, vector<16x256xf32>, vector<64x256xf32> -> vector<64x256xf32>
    %c0_3 = arith.constant 0 : index
    %c0_4 = arith.constant 0 : index
    %3 = vector.load %arg6[%c0_3, %c0_4] : memref<64x16xf32, #tpu.memory_space<vmem>>, vector<64x16xf32>
    %c0_5 = arith.constant 0 : index
    %c0_6 = arith.constant 0 : index
    %4 = vector.load %arg4[%c0_5, %c0_6] : memref<16x256xf32, #tpu.memory_space<vmem>>, vector<16x256xf32>
    %cst_7 = arith.constant dense<0.000000e+00> : vector<64x256xf32>
    %5 = tpu.matmul %3, %4, %cst_7 {dimension_numbers = #tpu.dot_dimension_numbers<[1], [0], [0], [1], [0, 0, 1, 1], [], []>} : vector<64x16xf32>, vector<16x256xf32>, vector<64x256xf32> -> vector<64x256xf32>
    %6 = arith.addf %2, %5 : vector<64x256xf32>
    %c0_8 = arith.constant 0 : index
    %c0_9 = arith.constant 0 : index
    %7 = vector.load %arg7[%c0_8, %c0_9] : memref<64x1xf32, #tpu.memory_space<vmem>>, vector<64x1xf32>
    %8 = vector.broadcast %7 : vector<64x1xf32> to vector<64x256xf32>
    %9 = arith.addf %6, %8 : vector<64x256xf32>
    %cst_10 = arith.constant 0.000000e+00 : f32
    %10 = vector.broadcast %cst_10 : f32 to vector<64x256xf32>
    %11 = arith.maximumf %9, %10 : vector<64x256xf32>
    %c0_11 = arith.constant 0 : index
    %c0_12 = arith.constant 0 : index
    %12 = vector.load %arg8[%c0_11, %c0_12] : memref<32x64xf32, #tpu.memory_space<vmem>>, vector<32x64xf32>
    %cst_13 = arith.constant dense<0.000000e+00> : vector<32x256xf32>
    %13 = tpu.matmul %12, %11, %cst_13 {dimension_numbers = #tpu.dot_dimension_numbers<[1], [0], [0], [1], [0, 0, 1, 1], [], []>} : vector<32x64xf32>, vector<64x256xf32>, vector<32x256xf32> -> vector<32x256xf32>
    %c0_14 = arith.constant 0 : index
    %c0_15 = arith.constant 0 : index
    %14 = vector.load %arg9[%c0_14, %c0_15] : memref<32x1xf32, #tpu.memory_space<vmem>>, vector<32x1xf32>
    %15 = vector.broadcast %14 : vector<32x1xf32> to vector<32x256xf32>
    %16 = arith.addf %13, %15 : vector<32x256xf32>
    %cst_16 = arith.constant 0.000000e+00 : f32
    %17 = vector.broadcast %cst_16 : f32 to vector<32x256xf32>
    %18 = arith.maximumf %16, %17 : vector<32x256xf32>
    %c0_17 = arith.constant 0 : index
    %c0_18 = arith.constant 0 : index
    %19 = vector.load %arg10[%c0_17, %c0_18] : memref<16x32xf32, #tpu.memory_space<vmem>>, vector<16x32xf32>
    %cst_19 = arith.constant dense<0.000000e+00> : vector<16x256xf32>
    %20 = tpu.matmul %19, %18, %cst_19 {dimension_numbers = #tpu.dot_dimension_numbers<[1], [0], [0], [1], [0, 0, 1, 1], [], []>} : vector<16x32xf32>, vector<32x256xf32>, vector<16x256xf32> -> vector<16x256xf32>
    %c0_20 = arith.constant 0 : index
    %c0_21 = arith.constant 0 : index
    %21 = vector.load %arg11[%c0_20, %c0_21] : memref<16x1xf32, #tpu.memory_space<vmem>>, vector<16x1xf32>
    %22 = vector.broadcast %21 : vector<16x1xf32> to vector<16x256xf32>
    %23 = arith.addf %20, %22 : vector<16x256xf32>
    %cst_22 = arith.constant 0.000000e+00 : f32
    %24 = vector.broadcast %cst_22 : f32 to vector<16x256xf32>
    %25 = arith.maximumf %23, %24 : vector<16x256xf32>
    %c0_23 = arith.constant 0 : index
    %c0_24 = arith.constant 0 : index
    %26 = vector.load %arg1[%c0_23, %c0_24] : memref<16x256xf32, #tpu.memory_space<vmem>>, vector<16x256xf32>
    %c0_25 = arith.constant 0 : index
    %c0_26 = arith.constant 0 : index
    %27 = vector.load %arg2[%c0_25, %c0_26] : memref<16x256xf32, #tpu.memory_space<vmem>>, vector<16x256xf32>
    %28 = arith.mulf %26, %27 : vector<16x256xf32>
    %c0_27 = arith.constant 0 : index
    %c0_28 = arith.constant 0 : index
    %29 = vector.load %arg12[%c0_27, %c0_28] : memref<16x1xf32, #tpu.memory_space<vmem>>, vector<16x1xf32>
    %30 = vector.broadcast %29 : vector<16x1xf32> to vector<16x256xf32>
    %31 = arith.mulf %28, %30 : vector<16x256xf32>
    %cst_29 = arith.constant dense<0.000000e+00> : vector<256xf32>
    %32 = vector.multi_reduction <add>, %31, %cst_29 [0] : vector<16x256xf32> to vector<256xf32>
    %33 = vector.shape_cast %32 : vector<256xf32> to vector<1x256xf32>
    %c0_30 = arith.constant 0 : index
    %c0_31 = arith.constant 0 : index
    %34 = vector.load %arg13[%c0_30, %c0_31] : memref<16x1xf32, #tpu.memory_space<vmem>>, vector<16x1xf32>
    %35 = vector.broadcast %34 : vector<16x1xf32> to vector<16x256xf32>
    %36 = arith.mulf %25, %35 : vector<16x256xf32>
    %cst_32 = arith.constant dense<0.000000e+00> : vector<256xf32>
    %37 = vector.multi_reduction <add>, %36, %cst_32 [0] : vector<16x256xf32> to vector<256xf32>
    %38 = vector.shape_cast %37 : vector<256xf32> to vector<1x256xf32>
    %39 = arith.addf %33, %38 : vector<1x256xf32>
    %c0_33 = arith.constant 0 : index
    %c0_34 = arith.constant 0 : index
    %40 = vector.load %arg14[%c0_33, %c0_34] : memref<1x1xf32, #tpu.memory_space<vmem>>, vector<1x1xf32>
    %41 = vector.broadcast %40 : vector<1x1xf32> to vector<1x256xf32>
    %42 = arith.addf %39, %41 : vector<1x256xf32>
    %43 = arith.negf %42 : vector<1x256xf32>
    %44 = math.exp %43 : vector<1x256xf32>
    %cst_35 = arith.constant 1.000000e+00 : f32
    %45 = vector.broadcast %cst_35 : f32 to vector<1x256xf32>
    %46 = arith.addf %45, %44 : vector<1x256xf32>
    %47 = arith.divf %45, %46 : vector<1x256xf32>
    %c0_36 = arith.constant 0 : index
    %c0_37 = arith.constant 0 : index
    %48 = vector.load %arg15[%c0_36, %c0_37] : memref<1x256xf32, #tpu.memory_space<vmem>>, vector<1x256xf32>
    tpu.vector_store %arg15[%c0_36, %c0_37], %47 {strides = array<i32>} : memref<1x256xf32, #tpu.memory_space<vmem>>, vector<1x256xf32>,
    return
  }
  func.func @transform_0(%arg0: i32) -> (i32, i32) {
    %c0_i32 = arith.constant 0 : i32
    %c0_i32_0 = arith.constant 0 : i32
    return %c0_i32, %arg0 : i32, i32
  }
  func.func @transform_1(%arg0: i32) -> (i32, i32) {
    %c0_i32 = arith.constant 0 : i32
    %c0_i32_0 = arith.constant 0 : i32
    return %c0_i32, %arg0 : i32, i32
  }
  func.func @transform_2(%arg0: i32) -> (i32, i32) {
    %c0_i32 = arith.constant 0 : i32
    %c0_i32_0 = arith.constant 0 : i32
    return %c0_i32, %arg0 : i32, i32
  }
  func.func @transform_3(%arg0: i32) -> (i32, i32) {
    %c0_i32 = arith.constant 0 : i32
    %c0_i32_0 = arith.constant 0 : i32
    return %c0_i32, %arg0 : i32, i32
  }
  func.func @transform_4(%arg0: i32) -> (i32, i32) {
    %c0_i32 = arith.constant 0 : i32
    %c0_i32_0 = arith.constant 0 : i32
    %c0_i32_1 = arith.constant 0 : i32
    return %c0_i32, %c0_i32_0 : i32, i32
  }
  func.func @transform_5(%arg0: i32) -> (i32, i32) {
    %c0_i32 = arith.constant 0 : i32
    %c0_i32_0 = arith.constant 0 : i32
    %c0_i32_1 = arith.constant 0 : i32
    return %c0_i32, %c0_i32_0 : i32, i32
  }
  func.func @transform_6(%arg0: i32) -> (i32, i32) {
    %c0_i32 = arith.constant 0 : i32
    %c0_i32_0 = arith.constant 0 : i32
    %c0_i32_1 = arith.constant 0 : i32
    return %c0_i32, %c0_i32_0 : i32, i32
  }
  func.func @transform_7(%arg0: i32) -> (i32, i32) {
    %c0_i32 = arith.constant 0 : i32
    %c0_i32_0 = arith.constant 0 : i32
    %c0_i32_1 = arith.constant 0 : i32
    return %c0_i32, %c0_i32_0 : i32, i32
  }
  func.func @transform_8(%arg0: i32) -> (i32, i32) {
    %c0_i32 = arith.constant 0 : i32
    %c0_i32_0 = arith.constant 0 : i32
    %c0_i32_1 = arith.constant 0 : i32
    return %c0_i32, %c0_i32_0 : i32, i32
  }
  func.func @transform_9(%arg0: i32) -> (i32, i32) {
    %c0_i32 = arith.constant 0 : i32
    %c0_i32_0 = arith.constant 0 : i32
    %c0_i32_1 = arith.constant 0 : i32
    return %c0_i32, %c0_i32_0 : i32, i32
  }
  func.func @transform_10(%arg0: i32) -> (i32, i32) {
    %c0_i32 = arith.constant 0 : i32
    %c0_i32_0 = arith.constant 0 : i32
    %c0_i32_1 = arith.constant 0 : i32
    return %c0_i32, %c0_i32_0 : i32, i32
  }
  func.func @transform_11(%arg0: i32) -> (i32, i32) {
    %c0_i32 = arith.constant 0 : i32
    %c0_i32_0 = arith.constant 0 : i32
    %c0_i32_1 = arith.constant 0 : i32
    return %c0_i32, %c0_i32_0 : i32, i32
  }
  func.func @transform_12(%arg0: i32) -> (i32, i32) {
    %c0_i32 = arith.constant 0 : i32
    %c0_i32_0 = arith.constant 0 : i32
    %c0_i32_1 = arith.constant 0 : i32
    return %c0_i32, %c0_i32_0 : i32, i32
  }
  func.func @transform_13(%arg0: i32) -> (i32, i32) {
    %c0_i32 = arith.constant 0 : i32
    %c0_i32_0 = arith.constant 0 : i32
    %c0_i32_1 = arith.constant 0 : i32
    return %c0_i32, %c0_i32_0 : i32, i32
  }
  func.func @transform_14(%arg0: i32) -> (i32, i32) {
    %c0_i32 = arith.constant 0 : i32
    %c0_i32_0 = arith.constant 0 : i32
    return %c0_i32, %arg0 : i32, i32
  }
}

</mosaic_0001>

<bundles_post_ra>
// kernel: neumf_forward.1
= control target key start
LH: loop header
LB: loop body
LE: loop exit
PB: predicated region body
PF: predicated region fallthrough
CT: control target
= control target key end

     0   :  { %s1846_s0 = inlined_call_operand.vmem [shape: f32[16,512], index: 0, kind: input, shape index: {}]   ;;  %s1847_s1 = inlined_call_operand.vmem [shape: f32[16,512], index: 1, kind: input, shape index: {}]   ;;  %s1848_s2 = inlined_call_operand.vmem [shape: f32[16,512], index: 2, kind: input, shape index: {}]   ;;  %s1849_s3 = inlined_call_operand.vmem [shape: f32[16,512], index: 3, kind: input, shape index: {}]   ;;  %s1850_s4 = inlined_call_operand.vmem [shape: f32[64,16], index: 4, kind: input, shape index: {}]   ;;  %s1851_s5 = inlined_call_operand.vmem [shape: f32[64,16], index: 5, kind: input, shape index: {}]   ;;  %s1852_s6 = inlined_call_operand.vmem [shape: f32[64,1], index: 6, kind: input, shape index: {}]   ;;  %s1853_s7 = inlined_call_operand.vmem [shape: f32[32,64], index: 7, kind: input, shape index: {}]   ;;  %s1854_s8 = inlined_call_operand.vmem [shape: f32[32,1], index: 8, kind: input, shape index: {}]   ;;  %s1855_s9 = inlined_call_operand.vmem [shape: f32[16,32], index: 9, kind: input, shape index: {}]   ;;  %s1856_s10 = inlined_call_operand.vmem [shape: f32[16,1], index: 10, kind: input, shape index: {}]   ;;  %s1857_s11 = inlined_call_operand.vmem [shape: f32[16,1], index: 11, kind: input, shape index: {}]   ;;  %s1858_s12 = inlined_call_operand.vmem [shape: f32[16,1], index: 12, kind: input, shape index: {}]   ;;  %s1859_s13 = inlined_call_operand.<no memory space> [shape: f32[1,1], index: 13, kind: input, shape index: {}]   ;;  %s1860_s14 = inlined_call_operand.vmem [shape: f32[1,512], index: 14, kind: output, shape index: {}]  }
   0x1   :  { %v19_v0 = vstv %s1859_s13 }
   0x2   :  { %20 = vst [vmem:[#allocation2] sm:$0x1] %v19_v0 }
   0x3   :  { %s1591_s15 = smov 0   ;;  %s1593_s16 = smov 0  }
   0x4   :  { %s1595_s17 = smov 0  }
   0x5 LB: > { %s1374_s13 = sadd.s32 4294967295, %s1510_s17   ;;  %s1608_s18 = sadd.s32 1, %s1510_s17   ;;  %s1510_s17 = sphi %s1595_s17, %s1866_s17   ;;  %s1506_s16 = sphi %s1593_s16, %s1865_s16   ;;  %s1502_s15 = sphi %s1591_s15, %s1864_s15  }
   0x6   : > { %s30_s19 = ssub.s32 %s1510_s17, %s1608_s18  ;;  %s33_s20 = sadd.s32 1, %s1506_s16 }
   0x7   : > { %p31_p0 = scmp.eq.s32.totalorder %s30_s19, 0  ;;  %p40_p1 = scmp.ne.s32.totalorder %s1506_s16, %s1502_s15 }
   0x8   : > { %p41_p2 = scmp.eq.s32.totalorder %s1510_s17, 0  ;;  %p1377_p4 = scmp.ge.s32.totalorder %s1510_s17, 2 }
   0x9   : > { %s1617_s21 = scalar_select %p31_p0, %s1506_s16, %s33_s20  }
   0xa   : > { %p1619_p3 = por %p41_p2, %p40_p1  ;;  %410 = sbr.rel (%p1377_p4) target bundleno = 47 (0x2f), region = 56 }
   0xf   : > { %413 = sbr.rel (!%p1619_p3) target bundleno = 23 (0x17), region = 60  ;;  %s415_s23 = sand.u32 (%p1619_p3), 1, %s1506_s16  }
  0x10   : > { %s1444_s24 = sshll.u32 (%p1619_p3), %s1510_s17, 4  ;;  %s1378_s25 = sshll.u32 (%p1619_p3), %s415_s23, 5 }
  0x11   : > { %s420_s28 = scalar_lea.vmem (%p1619_p3), %s1846_s0, %s1444_s24  ;;  %s417_s29 = scalar_lea.vmem (%p1619_p3), [#allocation3], %s1378_s25 }
  0x12   : > { %v433_v1 = vld [vmem:[%s420_s28] sm:$0xff] (%p1619_p3)  ;;  %v435_v2 = vld [vmem:[%s420_s28 + $0x8] sm:$0xff] (%p1619_p3) }
  0x13   : > { %v437_v3 = vld [vmem:[%s420_s28 + $0x20] sm:$0xff] (%p1619_p3)  ;;  %434 = vst [vmem:[%s417_s29] sm:$0xff] (%p1619_p3), %v433_v1  ;;  %v439_v4 = vld [vmem:[%s420_s28 + $0x28] sm:$0xff] (%p1619_p3) }
  0x14   : > { %436 = vst [vmem:[%s417_s29 + $0x8] sm:$0xff] %v435_v2 }
  0x15   : > { %438 = vst [vmem:[%s417_s29 + $0x10] sm:$0xff] %v437_v3 }
  0x16   : > { %440 = vst [vmem:[%s417_s29 + $0x18] sm:$0xff] %v439_v4 }
  0x17 PF: > { %446 = sbr.rel (!%p1619_p3) target bundleno = 31 (0x1f), region = 83  ;;  %s448_s30 = sand.u32 (%p1619_p3), 1, %s1506_s16  }
  0x18   : > { %s1445_s19 = sshll.u32 (%p1619_p3), %s1510_s17, 4  ;;  %s1381_s20 = sshll.u32 (%p1619_p3), %s448_s30, 5 }
  0x19   : > { %s453_s26 = scalar_lea.vmem (%p1619_p3), %s1847_s1, %s1445_s19  ;;  %s450_s25 = scalar_lea.vmem (%p1619_p3), [#allocation4], %s1381_s20 }
  0x1a   : > { %v466_v5 = vld [vmem:[%s453_s26] sm:$0xff] (%p1619_p3)  ;;  %v468_v6 = vld [vmem:[%s453_s26 + $0x8] sm:$0xff] (%p1619_p3) }
  0x1b   : > { %v470_v7 = vld [vmem:[%s453_s26 + $0x20] sm:$0xff] (%p1619_p3)  ;;  %467 = vst [vmem:[%s450_s25] sm:$0xff] (%p1619_p3), %v466_v5  ;;  %v472_v8 = vld [vmem:[%s453_s26 + $0x28] sm:$0xff] (%p1619_p3) }
  0x1c   : > { %469 = vst [vmem:[%s450_s25 + $0x8] sm:$0xff] %v468_v6 }
  0x1d   : > { %471 = vst [vmem:[%s450_s25 + $0x10] sm:$0xff] %v470_v7 }
  0x1e   : > { %473 = vst [vmem:[%s450_s25 + $0x18] sm:$0xff] %v472_v8 }
  0x1f PF: > { %479 = sbr.rel (!%p1619_p3) target bundleno = 39 (0x27), region = 106  ;;  %s481_s27 = sand.u32 (%p1619_p3), 1, %s1506_s16  }
  0x20   : > { %s1446_s28 = sshll.u32 (%p1619_p3), %s1510_s17, 4  ;;  %s1384_s29 = sshll.u32 (%p1619_p3), %s481_s27, 5 }
  0x21   : > { %s486_s23 = scalar_lea.vmem (%p1619_p3), %s1848_s2, %s1446_s28  ;;  %s483_s20 = scalar_lea.vmem (%p1619_p3), [#allocation5], %s1384_s29 }
  0x22   : > { %v499_v9 = vld [vmem:[%s486_s23] sm:$0xff] (%p1619_p3)  ;;  %v501_v10 = vld [vmem:[%s486_s23 + $0x8] sm:$0xff] (%p1619_p3) }
  0x23   : > { %v503_v11 = vld [vmem:[%s486_s23 + $0x20] sm:$0xff] (%p1619_p3)  ;;  %500 = vst [vmem:[%s483_s20] sm:$0xff] (%p1619_p3), %v499_v9  ;;  %v505_v12 = vld [vmem:[%s486_s23 + $0x28] sm:$0xff] (%p1619_p3) }
  0x24   : > { %502 = vst [vmem:[%s483_s20 + $0x8] sm:$0xff] %v501_v10 }
  0x25   : > { %504 = vst [vmem:[%s483_s20 + $0x10] sm:$0xff] %v503_v11 }
  0x26   : > { %506 = vst [vmem:[%s483_s20 + $0x18] sm:$0xff] %v505_v12 }
  0x27 PF: > { %512 = sbr.rel (!%p1619_p3) target bundleno = 47 (0x2f), region = 129  ;;  %s514_s24 = sand.u32 (%p1619_p3), 1, %s1506_s16  }
  0x28   : > { %s1447_s26 = sshll.u32 (%p1619_p3), %s1510_s17, 4  ;;  %s1387_s25 = sshll.u32 (%p1619_p3), %s514_s24, 5 }
  0x29   : > { %s519_s30 = scalar_lea.vmem (%p1619_p3), %s1849_s3, %s1447_s26  ;;  %s516_s29 = scalar_lea.vmem (%p1619_p3), [#allocation6], %s1387_s25 }
  0x2a   : > { %v532_v13 = vld [vmem:[%s519_s30] sm:$0xff] (%p1619_p3)  ;;  %v534_v14 = vld [vmem:[%s519_s30 + $0x8] sm:$0xff] (%p1619_p3) }
  0x2b   : > { %v536_v15 = vld [vmem:[%s519_s30 + $0x20] sm:$0xff] (%p1619_p3)  ;;  %533 = vst [vmem:[%s516_s29] sm:$0xff] (%p1619_p3), %v532_v13  ;;  %v538_v16 = vld [vmem:[%s519_s30 + $0x28] sm:$0xff] (%p1619_p3) }
  0x2c   : > { %535 = vst [vmem:[%s516_s29 + $0x8] sm:$0xff] %v534_v14 }
  0x2d   : > { %537 = vst [vmem:[%s516_s29 + $0x10] sm:$0xff] %v536_v15 }
  0x2e   : > { %539 = vst [vmem:[%s516_s29 + $0x18] sm:$0xff] %v538_v16 }
  0x2f PF: > { %p1390_p5 = scmp.ge.s32.totalorder %s1510_s17, 1  ;;  %p544_p6 = scmp.lt.s32.totalorder %s1510_s17, 3 }
  0x31   : > { %p545_p7 = pnand %p1390_p5, %p544_p6 }
  0x32   : > { %s551_s22 = sand.u32 (!%p545_p7), 1, %s1502_s15  }
  0x33   : > { %548 = sbr.rel (%p545_p7) target bundleno = 637 (0x27d), region = 152  ;;  %s1658_s20 = sshll.u32 (!%p545_p7), %s551_s22, 5 }
  0x34   : > { %s574_s25 = scalar_lea.vmem (!%p545_p7), [#allocation6], %s1658_s20  ;;  %s567_s28 = scalar_lea.vmem (!%p545_p7), [#allocation5], %s1658_s20 }
  0x35   : > { %s553_s15 = scalar_lea.vmem (!%p545_p7), [#allocation3], %s1658_s20  ;;  %s560_s27 = scalar_lea.vmem (!%p545_p7), [#allocation4], %s1658_s20 }
  0x36   : > { %s1395_s20 = sshll.u32 (!%p545_p7), %s1374_s13, 1 }
  0x37   : > { %p633_p8 = scmp.lt.s32.totalorder (!%p545_p7), %s1395_s20, 3 }
  0x38   : > { %v879_v17 = vld [vmem:[%s1852_s6 + $0x28] sm:$0xff]  ;;  %v1512_v18 = vmov 0   ;;  %v881_v19 = vld [vmem:[%s1852_s6 + $0x38] sm:$0xff]  ;;  %vm661_vm0 = vcmask 130048   ;;  %v649_v29 = vld [vmem:[%s1851_s5] sm:$0xff]  ;;  %vm982_vm1 = vcmask 523264  }
  0x39   : > { %1478 = vset.pattern.permute.xlu1 %v1512_v18  ;;  %1477 = vset.pattern.permute.xlu0 %v1512_v18  ;;  %v659_v20 = vld [vmem:[%s574_s25 + $0x10] sm:$0xff]  ;;  %v660_v21 = vld [vmem:[%s574_s25 + $0x18] sm:$0xff]  ;;  %v657_v22 = vld [vmem:[%s574_s25] sm:$0xff]  ;;  %vm1075_vm2 = vcmask 261120   ;;  %s1868_s20 = smov (!%p633_p8, %s1395_s20), 3  ;;  %vm1256_vm10 = vcmask 1040384  }
  0x3a   : > { %909 = vperm.xlu1 %1478, %v879_v17   ;;  %919 = vperm.xlu0 %1477, %v881_v19   ;;  %v658_v23 = vld [vmem:[%s574_s25 + $0x8] sm:$0xff]  ;;  %v656_v24 = vld [vmem:[%s1851_s5 + $0x38] sm:$0xff]  ;;  %v645_v27 = vld [vmem:[%s567_s28] sm:$0xff] }
  0x3b   : > { %1479 = vset.pattern.permute.xlu2 %v1512_v18  ;;  %1448 = vmatpush.msra.mxu2 %v659_v20  ;;  %v647_v25 = vld [vmem:[%s567_s28 + $0x10] sm:$0xff]  ;;  %v648_v26 = vld [vmem:[%s567_s28 + $0x18] sm:$0xff]  ;;  %v646_v28 = vld [vmem:[%s567_s28 + $0x8] sm:$0xff]  ;;  %s635_s28 = scalar_lea.vmem %s1860_s14, %s1868_s20 }
  0x3c   : > { %1450 = vmatpush.msra.mxu3 %v660_v21  ;;  %741 = vmatpush.msra.mxu1 %v660_v21  ;;  %v878_v30 = vld [vmem:[%s1852_s6 + $0x20] sm:$0xff]  ;;  %v880_v31 = vld [vmem:[%s1852_s6 + $0x30] sm:$0xff]  ;;  %v650_v33 = vld [vmem:[%s1851_s5 + $0x8] sm:$0xff] }
  0x3d   : > { %700 = vmatpush.msra.mxu0 %v659_v20  ;;  %1449 = vmatpush.msra.mxu2 %v657_v22  ;;  %v637_v32 = vld [vmem:[%s1850_s4] sm:$0xff]  ;;  %v875_v35 = vld [vmem:[%s1852_s6 + $0x8] sm:$0xff]  ;;  %v651_v37 = vld [vmem:[%s1851_s5 + $0x10] sm:$0xff] }
  0x3e   : > { %1451 = vmatpush.msra.mxu3 %v658_v23  ;;  %1403 = vmatmul.msk.f32.vlgmr.msra.gmra.mxu2 %vm661_vm0, %v656_v24  ;;  %v874_v34 = vld [vmem:[%s1852_s6] sm:$0xff]  ;;  %v638_v36 = vld [vmem:[%s1850_s4 + $0x8] sm:$0xff]  ;;  %v960_v38 = vld [vmem:[%s1854_s8 + $0x10] sm:$0xff] }
  0x3f   : > { %1411 = vmatmul.msk.f32.vlgmr.msra.gmra.mxu3 %vm661_vm0, %v656_v24  ;;  %806 = vmatpush.msrb.mxu2 %v647_v25  ;;  %v639_v39 = vld [vmem:[%s1850_s4 + $0x10] sm:$0xff]  ;;  %v877_v40 = vld [vmem:[%s1852_s6 + $0x18] sm:$0xff]  ;;  %v1063_v42 = vld [vmem:[%s1856_s10] sm:$0xff] }
  0x40   : > { %847 = vmatpush.msrb.mxu3 %v648_v26  ;;  %742 = vmatpush.msra.mxu1 %v658_v23  ;;  %v652_v41 = vld [vmem:[%s1851_s5 + $0x18] sm:$0xff]  ;;  %v959_v44 = vld [vmem:[%s1854_s8 + $0x8] sm:$0xff]  ;;  %v876_v45 = vld [vmem:[%s1852_s6 + $0x10] sm:$0xff] }
  0x41   : > { %701 = vmatpush.msra.mxu0 %v657_v22  ;;  %807 = vmatpush.msrb.mxu2 %v645_v27  ;;  %v640_v43 = vld [vmem:[%s1850_s4 + $0x18] sm:$0xff]  ;;  %v653_v46 = vld [vmem:[%s1851_s5 + $0x20] sm:$0xff]  ;;  %v1145_v47 = vld [vmem:[%s1857_s11 + $0x8] sm:$0xff] }
  0x42   : > { %848 = vmatpush.msrb.mxu3 %v646_v28  ;;  %1404 = vmatmul.msk.f32.vlgmr.msra.gmra.mxu1 %vm661_vm0, %v649_v29  ;;  %v641_v48 = vld [vmem:[%s1850_s4 + $0x20] sm:$0xff]  ;;  %v1064_v49 = vld [vmem:[%s1856_s10 + $0x8] sm:$0xff]  ;;  %v961_v50 = vld [vmem:[%s1854_s8 + $0x18] sm:$0xff] }
  0x43   : > { %1396 = vmatmul.msk.f32.vlgmr.msra.gmra.mxu0 %vm661_vm0, %v649_v29  ;;  %904 = vperm.xlu1 %1478, %v878_v30   ;;  %v654_v51 = vld [vmem:[%s1851_s5 + $0x28] sm:$0xff]  ;;  %v1206_v52 = vld [vmem:[#allocation2] sm:$0x1]  ;;  %v655_v56 = vld [vmem:[%s1851_s5 + $0x30] sm:$0xff] }
  0x44   : > { %914 = vperm.xlu0 %1477, %v880_v31   ;;  %899 = vperm.xlu2 %1479, %v877_v40   ;;  %v642_v53 = vld [vmem:[%s1850_s4 + $0x28] sm:$0xff]  ;;  %v1174_v54 = vld [vmem:[%s1858_s12] sm:$0xff]  ;;  %v643_v57 = vld [vmem:[%s1850_s4 + $0x30] sm:$0xff] }
  0x45   : > { %v958_v55 = vld [vmem:[%s1854_s8] sm:$0xff]  ;;  %v644_v59 = vld [vmem:[%s1850_s4 + $0x38] sm:$0xff]  ;;  %v1175_v60 = vld [vmem:[%s1858_s12 + $0x8] sm:$0xff] }
  0x46   : > { %1412 = vmatmul.msk.f32.vlgmr.msrb.gmra.mxu2 %vm661_vm0, %v637_v32  ;;  %v1144_v58 = vld [vmem:[%s1857_s11] sm:$0xff] }
  0x47   : > { %1420 = vmatmul.msk.f32.vlgmr.msrb.gmra.mxu3 %vm661_vm0, %v637_v32 }
  0x4a   : > { %1405 = vmatmul.msk.f32.gmra.mxu1 %vm661_vm0, %v650_v33 }
  0x4b   : > { %1397 = vmatmul.msk.f32.gmra.mxu0 %vm661_vm0, %v650_v33  ;;  %884 = vperm.xlu1 %1478, %v874_v34  }
  0x4c   : > { %889 = vperm.xlu0 %1477, %v875_v35   ;;  %894 = vperm.xlu2 %1479, %v876_v45  }
  0x4e   : > { %1413 = vmatmul.msk.f32.gmra.mxu2 %vm661_vm0, %v638_v36 }
  0x4f   : > { %1421 = vmatmul.msk.f32.gmra.mxu3 %vm661_vm0, %v638_v36 }
  0x52   : > { %1406 = vmatmul.msk.f32.gmra.mxu1 %vm661_vm0, %v651_v37 }
  0x53   : > { %1398 = vmatmul.msk.f32.gmra.mxu0 %vm661_vm0, %v651_v37  ;;  %969 = vperm.xlu1 %1478, %v959_v44  }
  0x54   : > { %974 = vperm.xlu0 %1477, %v960_v38   ;;  %979 = vperm.xlu2 %1479, %v961_v50  }
  0x56   : > { %1414 = vmatmul.msk.f32.gmra.mxu2 %vm661_vm0, %v639_v39 }
  0x57   : > { %1422 = vmatmul.msk.f32.gmra.mxu3 %vm661_vm0, %v639_v39 }
  0x5a   : > { %1407 = vmatmul.msk.f32.gmra.mxu1 %vm661_vm0, %v652_v41 }
  0x5b   : > { %1399 = vmatmul.msk.f32.gmra.mxu0 %vm661_vm0, %v652_v41  ;;  %1072 = vperm.xlu1 %1478, %v1064_v49  }
  0x5c   : > { %1067 = vperm.xlu0 %1477, %v1063_v42   ;;  %964 = vperm.xlu2 %1479, %v958_v55  }
  0x5e   : > { %1415 = vmatmul.msk.f32.gmra.mxu2 %vm661_vm0, %v640_v43 }
  0x5f   : > { %1423 = vmatmul.msk.f32.gmra.mxu3 %vm661_vm0, %v640_v43 }
  0x62   : > { %1408 = vmatmul.msk.f32.gmra.mxu1 %vm661_vm0, %v653_v46 }
  0x63   : > { %1400 = vmatmul.msk.f32.gmra.mxu0 %vm661_vm0, %v653_v46  ;;  %1178 = vperm.xlu1 %1478, %v1174_v54  }
  0x64   : > { %1153 = vperm.xlu0 %1477, %v1145_v47   ;;  %1148 = vperm.xlu2 %1479, %v1144_v58  }
  0x66   : > { %1416 = vmatmul.msk.f32.gmra.mxu2 %vm661_vm0, %v641_v48 }
  0x67   : > { %1424 = vmatmul.msk.f32.gmra.mxu3 %vm661_vm0, %v641_v48 }
  0x6a   : > { %1409 = vmatmul.msk.f32.gmra.mxu1 %vm661_vm0, %v654_v51 }
  0x6b   : > { %1401 = vmatmul.msk.f32.gmra.mxu0 %vm661_vm0, %v654_v51 }
  0x6c   : > { %1209 = vperm.xlu0 %1477, %v1206_v52   ;;  %1183 = vperm.xlu2 %1479, %v1175_v60  }
  0x6e   : > { %1417 = vmatmul.msk.f32.gmra.mxu2 %vm661_vm0, %v642_v53 }
  0x6f   : > { %1425 = vmatmul.msk.f32.gmra.mxu3 %vm661_vm0, %v642_v53 }
  0x72   : > { %1410 = vmatmul.msk.f32.gmra.mxu1 %vm661_vm0, %v655_v56 }
  0x73   : > { %1402 = vmatmul.msk.f32.gmra.mxu0 %vm661_vm0, %v655_v56 }
  0x76   : > { %1418 = vmatmul.msk.f32.gmra.mxu2 %vm661_vm0, %v643_v57 }
  0x77   : > { %1426 = vmatmul.msk.f32.gmra.mxu3 %vm661_vm0, %v643_v57 }
  0x7e   : > { %1419 = vmatmul.msk.f32.gmra.mxu2 %vm661_vm0, %v644_v59 }
  0x7f   : > { %1427 = vmatmul.msk.f32.gmra.mxu3 %vm661_vm0, %v644_v59 }
  0x9e   : > { %v900_v29 = vpop.permute.xlu2 %899 }
  0xa6   : > { %v895_v60 = vpop.permute.xlu2 %894 }
  0xac   : > { %v920_v23 = vpop.permute.xlu0 %919  ;;  %v910_v24 = vpop.permute.xlu1 %909 }
  0xb5   : > { %v905_v39 = vpop.permute.xlu1 %904 }
  0xb6   : > { %v915_v30 = vpop.permute.xlu0 %914 }
  0xbf   : > { %v1793_v61 = vpop.f32.mrf.mxu1 }
  0xc0   : > { %v1795_v62 = vpop.f32.mrf.mxu0 }
  0xc1   : > { %v724_v63 = vpop.f32.mrf.mxu2 }
  0xc2   : > { %v765_v0 = vpop.f32.mrf.mxu3 }
  0xc7   : > { %v747_v3 = vpop.f32.mrf.mxu1 }
  0xc8   : > { %v706_v4 = vpop.f32.mrf.mxu0 }
  0xc9   : > { %v1797_v1 = vpop.f32.mrf.mxu2 }
  0xca   : > { %v1799_v2 = vpop.f32.mrf.mxu3 }
  0xcf   : > { %v750_v7 = vpop.f32.mrf.mxu1 }
  0xd0   : > { %v709_v8 = vpop.f32.mrf.mxu0 }
  0xd1   : > { %v812_v5 = vpop.f32.mrf.mxu2 }
  0xd2   : > { %v853_v6 = vpop.f32.mrf.mxu3  ;;  %v813_v59 = vadd.f32 %v812_v5, %v706_v4  ;;  %v885_v5 = vpop.permute.xlu1 %884 }
  0xd3   : > { %v854_v58 = vadd.f32 %v853_v6, %v747_v3 }
  0xd7   : > { %v753_v11 = vpop.f32.mrf.mxu1 }
  0xd8   : > { %v712_v12 = vpop.f32.mrf.mxu0 }
  0xd9   : > { %v815_v9 = vpop.f32.mrf.mxu2 }
  0xda   : > { %v856_v10 = vpop.f32.mrf.mxu3  ;;  %v816_v53 = vadd.f32 %v815_v9, %v709_v8  ;;  %v890_v8 = vpop.permute.xlu0 %889 }
  0xdb   : > { %v857_v52 = vadd.f32 %v856_v10, %v750_v7  ;;  %v810_v7 = vadd.f32 %v1797_v1, %v1795_v62  ;;  %v925_v6 = vadd.f32 %v890_v8, %v854_v58  ;;  %v1138_v58 = vld [vmem:[%s560_s27 + $0x10] sm:$0xff] }
  0xdc   : > { %v926_v4 = vadd.f32 %v895_v60, %v816_v53  ;;  %v1061_v53 = vld [vmem:[%s1855_s9] sm:$0xff] }
  0xdd   : > { %v927_v9 = vadd.f32 %v895_v60, %v857_v52  ;;  %v922_v62 = vadd.f32 %v885_v5, %v810_v7  ;;  %v1132_v60 = vld [vmem:[%s553_s15] sm:$0xff] }
  0xdf   : > { %v756_v15 = vpop.f32.mrf.mxu1 }
  0xe0   : > { %v715_v16 = vpop.f32.mrf.mxu0 }
  0xe1   : > { %v818_v13 = vpop.f32.mrf.mxu2 }
  0xe2   : > { %v859_v14 = vpop.f32.mrf.mxu3  ;;  %v819_v47 = vadd.f32 %v818_v13, %v712_v12  ;;  %v851_v13 = vadd.f32 %v1799_v2, %v1793_v61  ;;  %v942_v61 = vmax.f32 %v926_v4, 0.0  ;;  %v943_v2 = vmax.f32 %v927_v9, 0.0 }
  0xe3   : > { %v860_v46 = vadd.f32 %v859_v14, %v753_v11 }
  0xe4   : > { %v928_v11 = vadd.f32 %v900_v29, %v819_v47 }
  0xe5   : > { %v929_v12 = vadd.f32 %v900_v29, %v860_v46 }
  0xe6   : > { %v944_v14 = vmax.f32 %v928_v11, 0.0  ;;  %v1137_v11 = vld [vmem:[%s560_s27 + $0x8] sm:$0xff] }
  0xe7   : > { %v759_v21 = vpop.f32.mrf.mxu1 }
  0xe8   : > { %v718_v22 = vpop.f32.mrf.mxu0 }
  0xe9   : > { %v821_v17 = vpop.f32.mrf.mxu2 }
  0xea   : > { %v862_v18 = vpop.f32.mrf.mxu3  ;;  %v822_v41 = vadd.f32 %v821_v17, %v715_v16  ;;  %v924_v16 = vadd.f32 %v890_v8, %v813_v59  ;;  %v923_v17 = vadd.f32 %v885_v5, %v851_v13  ;;  %v1139_v59 = vld [vmem:[%s560_s27 + $0x18] sm:$0xff] }
  0xeb   : > { %v863_v40 = vadd.f32 %v862_v18, %v756_v15  ;;  %v945_v15 = vmax.f32 %v929_v12, 0.0  ;;  %v941_v18 = vmax.f32 %v925_v6, 0.0 }
  0xec   : > { %v930_v56 = vadd.f32 %v905_v39, %v822_v41  ;;  %v940_v1 = vmax.f32 %v924_v16, 0.0 }
  0xed   : > { %v931_v57 = vadd.f32 %v905_v39, %v863_v40  ;;  %v970_v39 = vpop.permute.xlu1 %969 }
  0xee   : > { %v946_v10 = vmax.f32 %v930_v56, 0.0  ;;  %v1134_v56 = vld [vmem:[%s553_s15 + $0x10] sm:$0xff] }
  0xef   : > { %v762_v27 = vpop.f32.mrf.mxu1  ;;  %v947_v3 = vmax.f32 %v931_v57, 0.0  ;;  %v1135_v57 = vld [vmem:[%s553_s15 + $0x18] sm:$0xff]  ;;  %v1142_v12 = vmul.f32 %v1138_v58, %v1134_v56 }
  0xf0   : > { %v721_v28 = vpop.f32.mrf.mxu0  ;;  %v1143_v13 = vmul.f32 %v1139_v59, %v1135_v57 }
  0xf1   : > { %v824_v19 = vpop.f32.mrf.mxu2 }
  0xf2   : > { %v865_v20 = vpop.f32.mrf.mxu3  ;;  %v825_v36 = vadd.f32 %v824_v19, %v718_v22  ;;  %v938_v19 = vmax.f32 %v922_v62, 0.0  ;;  %v955_v22 = vld [vmem:[%s1853_s7 + $0x8] sm:$0xff] }
  0xf3   : > { %v866_v35 = vadd.f32 %v865_v20, %v759_v21  ;;  %v939_v20 = vmax.f32 %v923_v17, 0.0  ;;  %v954_v21 = vld [vmem:[%s1853_s7] sm:$0xff] }
  0xf4   : > { %v932_v50 = vadd.f32 %v910_v24, %v825_v36 }
  0xf5   : > { %v933_v51 = vadd.f32 %v910_v24, %v866_v35  ;;  %v957_v24 = vld [vmem:[%s1853_s7 + $0x18] sm:$0xff]  ;;  %v1073_v16 = vpop.permute.xlu1 %1072 }
  0xf9   : > { %v827_v25 = vpop.f32.mrf.mxu2 }
  0xfa   : > { %v868_v26 = vpop.f32.mrf.mxu3  ;;  %v828_v32 = vadd.f32 %v827_v25, %v721_v28 }
  0xfb   : > { %v869_v31 = vadd.f32 %v868_v26, %v762_v27 }
  0xfc   : > { %v934_v44 = vadd.f32 %v915_v30, %v828_v32  ;;  %v975_v32 = vpop.permute.xlu0 %974 }
  0xfd   : > { %v935_v45 = vadd.f32 %v915_v30, %v869_v31  ;;  %v980_v31 = vpop.permute.xlu2 %979 }
  0xfe   : > { %v950_v54 = vmax.f32 %v934_v44, 0.0 }
  0xff   : > { %v951_v55 = vmax.f32 %v935_v45, 0.0 }
 0x101   : > { %v830_v33 = vpop.f32.mrf.mxu2 }
 0x102   : > { %v871_v34 = vpop.f32.mrf.mxu3  ;;  %v831_v37 = vadd.f32 %v830_v33, %v724_v63  ;;  %v948_v63 = vmax.f32 %v932_v50, 0.0 }
 0x103   : > { %v872_v38 = vadd.f32 %v871_v34, %v765_v0  ;;  %v949_v0 = vmax.f32 %v933_v51, 0.0 }
 0x104   : > { %v936_v42 = vadd.f32 %v920_v23, %v831_v37 }
 0x105   : > { %v937_v43 = vadd.f32 %v920_v23, %v872_v38  ;;  %v956_v23 = vld [vmem:[%s1853_s7 + $0x10] sm:$0xff]  ;;  %v965_v44 = vpop.permute.xlu2 %964 }
 0x106   : > { %v952_v48 = vmax.f32 %v936_v42, 0.0 }
 0x107   : > { %v953_v49 = vmax.f32 %v937_v43, 0.0 }
 0x108   : > { %1003 = vmatpush.msrb.mxu0 %v952_v48 }
 0x109   : > { %1032 = vmatpush.msrb.mxu1 %v953_v49 }
 0x10a   : > { %1004 = vmatpush.msrb.mxu0 %v950_v54  ;;  %v1062_v54 = vld [vmem:[%s1855_s9 + $0x8] sm:$0xff] }
 0x10b   : > { %1033 = vmatpush.msrb.mxu1 %v951_v55  ;;  %v1068_v55 = vpop.permute.xlu0 %1067 }
 0x10c   : > { %1005 = vmatpush.msrb.mxu0 %v948_v63  ;;  %v1133_v63 = vld [vmem:[%s553_s15 + $0x8] sm:$0xff] }
 0x10d   : > { %1034 = vmatpush.msrb.mxu1 %v949_v0  ;;  %v1136_v0 = vld [vmem:[%s560_s27] sm:$0xff]  ;;  %v1141_v8 = vmul.f32 %v1137_v11, %v1133_v63  ;;  %v1149_v9 = vpop.permute.xlu2 %1148 }
 0x10e   : > { %1006 = vmatpush.msrb.mxu0 %v946_v10  ;;  %v1140_v7 = vmul.f32 %v1136_v0, %v1132_v60 }
 0x10f   : > { %1035 = vmatpush.msrb.mxu1 %v947_v3  ;;  %v1157_v6 = vmul.f32 %v1149_v9, %v1141_v8 }
 0x110   : > { %1007 = vmatpush.msrb.mxu0 %v944_v14  ;;  %v1156_v5 = vmul.f32 %v1149_v9, %v1140_v7 }
 0x111   : > { %1036 = vmatpush.msrb.mxu1 %v945_v15 }
 0x112   : > { %1008 = vmatpush.msrb.mxu0 %v942_v61 }
 0x113   : > { %1037 = vmatpush.msrb.mxu1 %v943_v2  ;;  %v1154_v10 = vpop.permute.xlu0 %1153 }
 0x114   : > { %1009 = vmatpush.msrb.mxu0 %v940_v1  ;;  %v1158_v3 = vmul.f32 %v1154_v10, %v1142_v12  ;;  %v1159_v4 = vmul.f32 %v1154_v10, %v1143_v13 }
 0x115   : > { %1038 = vmatpush.msrb.mxu1 %v941_v18 }
 0x116   : > { %1010 = vmatpush.msrb.mxu0 %v938_v19  ;;  %v1160_v17 = vadd.f32 %v1158_v3, %v1156_v5  ;;  %v1167_v61 = vadd.f32 %v1159_v4, %v1157_v6 }
 0x117   : > { %1039 = vmatpush.msrb.mxu1 %v939_v20  ;;  %1428 = vmatmul.msk.f32.vlgmr.msrb.gmra.mxu0 %vm982_vm1, %v954_v21 }
 0x118   : > { %1432 = vmatmul.msk.f32.vlgmr.msrb.gmra.mxu1 %vm982_vm1, %v954_v21  ;;  %v1161_v1 = vrot.slane %v1160_v17, 4  ;;  %v1168_v18 = vrot.slane %v1167_v61, 4 }
 0x11f   : > { %1429 = vmatmul.msk.f32.gmra.mxu0 %vm982_vm1, %v955_v22 }
 0x120   : > { %1433 = vmatmul.msk.f32.gmra.mxu1 %vm982_vm1, %v955_v22 }
 0x127   : > { %1430 = vmatmul.msk.f32.gmra.mxu0 %vm982_vm1, %v956_v23 }
 0x128   : > { %1434 = vmatmul.msk.f32.gmra.mxu1 %vm982_vm1, %v956_v23 }
 0x12f   : > { %1431 = vmatmul.msk.f32.gmra.mxu0 %vm982_vm1, %v957_v24 }
 0x130   : > { %1435 = vmatmul.msk.f32.gmra.mxu1 %vm982_vm1, %v957_v24 }
 0x194   : > { %v1012_v25 = vpop.f32.mrf.mxu0 }
 0x195   : > { %v1041_v26 = vpop.f32.mrf.mxu1  ;;  %v1013_v45 = vadd.f32 %v1012_v25, %v965_v44  ;;  %v1162_v25 = vadd.f32 %v1161_v1, %v1160_v17 }
 0x196   : > { %v1042_v46 = vadd.f32 %v1041_v26, %v965_v44  ;;  %v1169_v26 = vadd.f32 %v1168_v18, %v1167_v61 }
 0x197   : > { %v1053_v51 = vmax.f32 %v1013_v45, 0.0 }
 0x198   : > { %v1054_v52 = vmax.f32 %v1042_v46, 0.0 }
 0x19c   : > { %v1015_v27 = vpop.f32.mrf.mxu0 }
 0x19d   : > { %v1044_v28 = vpop.f32.mrf.mxu1  ;;  %v1016_v40 = vadd.f32 %v1015_v27, %v970_v39 }
 0x19e   : > { %v1045_v41 = vadd.f32 %v1044_v28, %v970_v39 }
 0x19f   : > { %v1055_v49 = vmax.f32 %v1016_v40, 0.0 }
 0x1a0   : > { %v1056_v50 = vmax.f32 %v1045_v41, 0.0 }
 0x1a4   : > { %v1018_v29 = vpop.f32.mrf.mxu0 }
 0x1a5   : > { %v1047_v30 = vpop.f32.mrf.mxu1  ;;  %v1019_v35 = vadd.f32 %v1018_v29, %v975_v32  ;;  %v1179_v29 = vpop.permute.xlu1 %1178 }
 0x1a6   : > { %v1048_v36 = vadd.f32 %v1047_v30, %v975_v32  ;;  %v1184_v30 = vpop.permute.xlu2 %1183 }
 0x1a7   : > { %v1057_v47 = vmax.f32 %v1019_v35, 0.0  ;;  %v1163_v35 = vrot.slane %v1162_v25, 2 }
 0x1a8   : > { %v1058_v48 = vmax.f32 %v1048_v36, 0.0  ;;  %v1170_v36 = vrot.slane %v1169_v26, 2 }
 0x1a9   : > { %v1164_v41 = vadd.f32 %v1163_v35, %v1162_v25 }
 0x1ac   : > { %v1021_v33 = vpop.f32.mrf.mxu0 }
 0x1ad   : > { %v1050_v34 = vpop.f32.mrf.mxu1  ;;  %v1022_v37 = vadd.f32 %v1021_v33, %v980_v31 }
 0x1ae   : > { %v1051_v38 = vadd.f32 %v1050_v34, %v980_v31 }
 0x1af   : > { %v1059_v42 = vmax.f32 %v1022_v37, 0.0 }
 0x1b0   : > { %v1060_v43 = vmax.f32 %v1051_v38, 0.0 }
 0x1b1   : > { %1094 = vmatpush.msra.mxu2 %v1059_v42  ;;  %v1171_v42 = vadd.f32 %v1170_v36, %v1169_v26 }
 0x1b2   : > { %1117 = vmatpush.msra.mxu3 %v1060_v43 }
 0x1b3   : > { %1095 = vmatpush.msra.mxu2 %v1057_v47  ;;  %v1165_v47 = vrot.slane %v1164_v41, 1 }
 0x1b4   : > { %1118 = vmatpush.msra.mxu3 %v1058_v48  ;;  %v1172_v48 = vrot.slane %v1171_v42, 1 }
 0x1b5   : > { %1096 = vmatpush.msra.mxu2 %v1055_v49 }
 0x1b6   : > { %1119 = vmatpush.msra.mxu3 %v1056_v50 }
 0x1b7   : > { %1097 = vmatpush.msra.mxu2 %v1053_v51 }
 0x1b8   : > { %1120 = vmatpush.msra.mxu3 %v1054_v52  ;;  %1436 = vmatmul.msk.f32.vlgmr.msra.gmra.mxu2 %vm1075_vm2, %v1061_v53 }
 0x1b9   : > { %1438 = vmatmul.msk.f32.vlgmr.msra.gmra.mxu3 %vm1075_vm2, %v1061_v53  ;;  %v1210_v53 = vpop.permute.xlu0 %1209 }
 0x1ba   : > { %v1212_v58 = vperm.slane %v1210_v53, 0 }
 0x1c0   : > { %1437 = vmatmul.msk.f32.gmra.mxu2 %vm1075_vm2, %v1062_v54 }
 0x1c1   : > { %1439 = vmatmul.msk.f32.gmra.mxu3 %vm1075_vm2, %v1062_v54  ;;  %v1166_v54 = vadd.f32 %v1165_v47, %v1164_v41 }
 0x23b   : > { %v1099_v14 = vpop.f32.mrf.mxu2 }
 0x23c   : > { %v1122_v15 = vpop.f32.mrf.mxu3  ;;  %v1100_v2 = vadd.f32 %v1099_v14, %v1068_v55 }
 0x23d   : > { %v1123_v62 = vadd.f32 %v1122_v15, %v1068_v55  ;;  %v1173_v55 = vadd.f32 %v1172_v48, %v1171_v42 }
 0x23e   : > { %v1128_v21 = vmax.f32 %v1100_v2, 0.0 }
 0x23f   : > { %v1129_v22 = vmax.f32 %v1123_v62, 0.0 }
 0x240   : > { %v1186_v31 = vmul.f32 %v1179_v29, %v1128_v21 }
 0x241   : > { %v1187_v32 = vmul.f32 %v1179_v29, %v1129_v22 }
 0x243   : > { %v1102_v19 = vpop.f32.mrf.mxu2 }
 0x244   : > { %v1125_v20 = vpop.f32.mrf.mxu3  ;;  %v1103_v23 = vadd.f32 %v1102_v19, %v1073_v16 }
 0x245   : > { %v1126_v24 = vadd.f32 %v1125_v20, %v1073_v16  ;;  %v1259_v20 = vlaneseq }
 0x246   : > { %v1130_v27 = vmax.f32 %v1103_v23, 0.0 }
 0x247   : > { %v1131_v28 = vmax.f32 %v1126_v24, 0.0  ;;  %vm1261_vm12 = vcmp.lt.s32.totalorder %v1259_v20, 256 }
 0x248   : > { %v1188_v33 = vmul.f32 %v1184_v30, %v1130_v27 }
 0x249   : > { %v1189_v34 = vmul.f32 %v1184_v30, %v1131_v28 }
 0x24a   : > { %v1190_v37 = vadd.f32 %v1188_v33, %v1186_v31 }
 0x24b   : > { %v1197_v38 = vadd.f32 %v1189_v34, %v1187_v32 }
 0x24c   : > { %v1191_v39 = vrot.slane %v1190_v37, 4 }
 0x24d   : > { %v1198_v40 = vrot.slane %v1197_v38, 4 }
 0x24e   : > { %v1192_v43 = vadd.f32 %v1191_v39, %v1190_v37 }
 0x24f   : > { %v1199_v44 = vadd.f32 %v1198_v40, %v1197_v38 }
 0x250   : > { %v1193_v45 = vrot.slane %v1192_v43, 2 }
 0x251   : > { %v1200_v46 = vrot.slane %v1199_v44, 2 }
 0x252   : > { %v1194_v49 = vadd.f32 %v1193_v45, %v1192_v43 }
 0x253   : > { %v1201_v50 = vadd.f32 %v1200_v46, %v1199_v44 }
 0x254   : > { %v1195_v51 = vrot.slane %v1194_v49, 1 }
 0x255   : > { %v1202_v52 = vrot.slane %v1201_v50, 1 }
 0x256   : > { %v1196_v56 = vadd.f32 %v1195_v51, %v1194_v49 }
 0x257   : > { %v1203_v57 = vadd.f32 %v1202_v52, %v1201_v50 }
 0x258   : > { %v1204_v59 = vadd.f32 %v1196_v56, %v1166_v54 }
 0x259   : > { %v1205_v60 = vadd.f32 %v1203_v57, %v1173_v55 }
 0x25a   : > { %v1213_v63 = vadd.f32 %v1212_v58, %v1204_v59 }
 0x25b   : > { %v1214_v0 = vadd.f32 %v1212_v58, %v1205_v60 }
 0x25c   : > { %v1440_v11 = vmul.f32 -1.442695, %v1213_v63 }
 0x25d   : > { %v1441_v12 = vmul.f32 -1.442695, %v1214_v0 }
 0x25e   : > { %1480 = vpow2.f32 %v1440_v11 }
 0x25f   : > { %1482 = vpow2.f32 %v1441_v12 }
 0x264   : > { %v1481_v13 = vpop.eup %1480 }
 0x265   : > { %v1483_v7 = vpop.eup %1482  ;;  %v1221_v8 = vadd.f32 1.0, %v1481_v13 }
 0x266   : > { %v1222_v9 = vadd.f32 1.0, %v1483_v7 }
 0x267   : > { %1484 = vrcp.f32 %v1221_v8  ;;  %vm1228_vm5 = vweird.f32 %v1221_v8  ;;  %v1234_v62 = vand.u32 2147483648, %v1221_v8  ;;  %v1232_v18 = vand.u32 2147483647, %v1221_v8 }
 0x268   : > { %1486 = vrcp.f32 %v1222_v9  ;;  %v1249_v16 = vand.u32 2147483648, %v1222_v9  ;;  %v1247_v61 = vand.u32 2147483647, %v1222_v9  ;;  %vm1243_vm7 = vweird.f32 %v1222_v9 }
 0x269   : > { %v1235_v24 = vor.u32 1.1754944e-38, %v1234_v62  ;;  %vm1233_vm11 = vcmp.eq.f32.partialorder %v1232_v18, 8.507059e+37 }
 0x26a   : > { %v1250_v21 = vor.u32 1.1754944e-38, %v1249_v16  ;;  %vm1248_vm9 = vcmp.eq.f32.partialorder %v1247_v61, 8.507059e+37 }
 0x26d   : > { %v1485_v10 = vpop.eup %1484 }
 0x26e   : > { %v1487_v3 = vpop.eup %1486  ;;  %v1224_v4 = vmul.f32 %v1485_v10, %v1221_v8  ;;  %vm1229_vm3 = vweird.f32 %v1485_v10 }
 0x26f   : > { %v1239_v5 = vmul.f32 %v1487_v3, %v1222_v9  ;;  %vm1244_vm4 = vweird.f32 %v1487_v3  ;;  %vm1827_vm6 = vmor %vm1228_vm5, %vm1229_vm3 }
 0x270   : > { %v1225_v6 = vsub.f32 1.0, %v1224_v4  ;;  %vm1245_vm8 = vmor %vm1243_vm7, %vm1244_vm4 }
 0x271   : > { %v1240_v14 = vsub.f32 1.0, %v1239_v5 }
 0x272   : > { %v1226_v15 = vmul.f32 %v1485_v10, %v1225_v6 }
 0x273   : > { %v1241_v17 = vmul.f32 %v1487_v3, %v1240_v14 }
 0x274   : > { %v1227_v2 = vadd.f32 %v1485_v10, %v1226_v15 }
 0x275   : > { %v1242_v19 = vadd.f32 %v1487_v3, %v1241_v17 }
 0x276   : > { %v1231_v22 = vsel %vm1827_vm6, %v1485_v10, %v1227_v2 }
 0x277   : > { %v1246_v23 = vsel %vm1245_vm8, %v1487_v3, %v1242_v19  ;;  %v1236_v27 = vsel %vm1233_vm11, %v1235_v24, %v1231_v22 }
 0x278   : > { %v1251_v25 = vsel %vm1248_vm9, %v1250_v21, %v1246_v23 }
 0x279   : > { %v1255_v26 = vrot.slane %v1251_v25, 7 }
 0x27b   : > { %v1257_v28 = vsel %vm1256_vm10, %v1236_v27, %v1255_v26 }
 0x27c   : > { %1263 = vst.msk [vmem:[%s635_s28] sm:$0x3] %vm1261_vm12, %v1257_v28 }
 0x27d PF: > { %p23_p9 = scmp.ge.s32.totalorder %s1608_s18, 4   ;;  %s1864_s15 = smov %s1506_s16 }
 0x27e   : > { %s1865_s16 = smov %s1617_s21  ;;  %s1866_s17 = smov %s1608_s18 }
 0x27f   :  { %25 = sbr.rel (!%p23_p9) target bundleno = 5 (0x5), region = 227 }

</bundles_post_ra>
